<compile_context>
chip_gen: v5e
topology: v5e:2x2
jax: 0.10.0
libtpu: 0.0.40
codegen_flags: <defaults>
</compile_context>

<pallas_src>
import jax
import jax.numpy as jnp
from jax.experimental import pallas as pl
from jax.experimental.pallas import tpu as pltpu


def _identity_dma_kernel(x_hbm_ref, o_hbm_ref, sem):
    # MindEyeModule.forward(x) == x : one whole-array HBM->HBM DMA.
    cp = pltpu.make_async_copy(x_hbm_ref, o_hbm_ref, sem)
    cp.start()
    cp.wait()


def mindeye_forward(x: jax.Array) -> jax.Array:
    """Identity forward pass of MindEyeModule via a single HBM->HBM DMA."""
    nbytes = x.size * jnp.dtype(x.dtype).itemsize
    return pl.pallas_call(
        _identity_dma_kernel,
        out_shape=jax.ShapeDtypeStruct(x.shape, x.dtype),
        in_specs=[pl.BlockSpec(memory_space=pl.ANY)],
        out_specs=pl.BlockSpec(memory_space=pl.ANY),
        scratch_shapes=[pltpu.SemaphoreType.DMA],
        cost_estimate=pl.CostEstimate(
            flops=0,
            transcendentals=0,
            bytes_accessed=2 * nbytes,  # read x + write out
        ),
    )(x)


mindeye_forward_jit = jax.jit(mindeye_forward)


if __name__ == "__main__":
    key = jax.random.PRNGKey(0)

    # Small NCHW-style input consistent with typical usage: batch=2, channels=4, 16x16.
    x = jax.random.normal(key, (2, 4, 16, 16), dtype=jnp.float32)
    y = jax.block_until_ready(mindeye_forward_jit(x))
    assert y.shape == x.shape, (y.shape, x.shape)
    assert y.dtype == x.dtype, (y.dtype, x.dtype)
    assert bool(jnp.all(y == x)), "identity forward mismatch (NCHW f32)"

    # Odd, non-tile-aligned shape: no padding/reshape needed for the DMA path.
    x2 = jax.random.normal(jax.random.PRNGKey(1), (3, 5, 7), dtype=jnp.float32)
    y2 = jax.block_until_ready(mindeye_forward_jit(x2))
    assert y2.shape == x2.shape and y2.dtype == x2.dtype
    assert bool(jnp.all(y2 == x2)), "identity forward mismatch (odd shape)"

    print("KERNEL_OK")
</pallas_src>

<mosaic_0001>
module attributes {stable_mosaic.version = 11 : i64} {
  func.func @_identity_dma_kernel(%arg0: memref<2x4x16x16xf32, #tpu.memory_space<any>>, %arg1: memref<2x4x16x16xf32, #tpu.memory_space<any>>, %arg2: memref<!tpu.dma_semaphore, #tpu.memory_space<semaphore_mem>>) attributes {dimension_semantics = [], scalar_prefetch = 0 : i64, scratch_operands = 1 : i64, tpu.core_type = #tpu.core_type<tc>} {
    tpu.enqueue_dma source(%arg0 : memref<2x4x16x16xf32, #tpu.memory_space<any>>) target(%arg1 : memref<2x4x16x16xf32, #tpu.memory_space<any>>) target_semaphore(%arg2 : memref<!tpu.dma_semaphore, #tpu.memory_space<semaphore_mem>>)
    tpu.wait_dma2 semaphore(%arg2 : memref<!tpu.dma_semaphore, #tpu.memory_space<semaphore_mem>>) src(%arg0 : memref<2x4x16x16xf32, #tpu.memory_space<any>>) dst(%arg1 : memref<2x4x16x16xf32, #tpu.memory_space<any>>)
    return
  }
}

</mosaic_0001>

<bundles_post_ra>
// kernel: mindeye_forward.1
= control target key start
LH: loop header
LB: loop body
LE: loop exit
PB: predicated region body
PF: predicated region fallthrough
CT: control target
= control target key end

     0   :  { %s34_s12 = smov [#allocation2]   ;;  %s35_s13 = smov [#allocation3]   ;;  %s53_s0 = inlined_call_operand.hbm [shape: f32[2,4,16,16], index: 0, kind: input, shape index: {}]   ;;  %s54_s1 = inlined_call_operand.hbm [shape: f32[2,4,16,16], index: 1, kind: output, shape index: {}]  }
   0x1   :  { %s10_s8 = sshll.u32 %s53_s0, 4  ;;  %s12_s11 = sshll.u32 %s54_s1, 4  ;;  %s11_s8 = int_to_ptr.hbm [resolvable:$true] %s10_s8  ;;  %s13_s11 = int_to_ptr.hbm [resolvable:$true] %s12_s11 }
   0x2   :  { %s36_s14 = smov 0  }
   0x3   :  { %16 = dma.general %s11_s8, 2048, %s13_s11, %s34_s12, %s35_s13, [#allocation4], %s36_s14, 0  }
   0x4   :  { %32 = dma.done.wait [#allocation2], 2048 }
   0x5   :  { %33 = vsyncadd [#allocation2], 4294965248 }
   0x6   :  { %22 = vsyncmov [#allocation2] }
   0x9   :  { %s23_s15 = vpop.sfrf %22 }
   0xa   :  { %p28_p0 = scmp.ne.s32.totalorder %s23_s15, 0 }
   0xc   :  { %27 = shalt.err (%p28_p0)  }

</bundles_post_ra>
